<compile_context>
chip_gen: v7x
topology: tpu7x:2x2x1
jax: 0.10.0
libtpu: 0.0.40
codegen_flags: <defaults>
</compile_context>

<pallas_src>
import jax
import jax.numpy as jnp
import numpy as np
from jax import lax
from jax.experimental import pallas as pl
from jax.experimental.pallas import tpu as pltpu


def _self_attention_kernel(c_ref, mcol_ref, mrow_ref, cwqw_ref, cqw_ref,
                           bias_ref, out_ref):
    H = c_ref.shape[2]
    c = c_ref[0]                       # (L, H) f32
    mask_col = mcol_ref[0]             # (L, 1) f32 (masks dim=1 of s)
    mask_row = mrow_ref[0]             # (1, L) f32 (masks dim=2 of s)
    cwqw = cwqw_ref[...]               # (H, 2)  [c_weight | q_weight]
    cqw = cqw_ref[...]                 # (1, H)
    bias = bias_ref[0, 0]              # scalar

    # --- similarity matrix s = s0 + s1^T + s2 + bias   (L, L) ---
    s01 = jnp.dot(c, cwqw, preferred_element_type=jnp.float32)       # (L, 2)
    s0 = s01[:, 0:1]                                                 # (L, 1)
    s1_row = s01[:, 1:2].T + bias                                    # (1, L)
    # (c * cqw) @ c^T, contracting the H axes directly (no transpose of c).
    s2 = lax.dot_general(c * cqw, c, (((1,), (1,)), ((), ())),
                         preferred_element_type=jnp.float32)         # (L, L)
    s = s2 + s0 + s1_row                                             # (L, L)

    # --- masked softmax over dim=2 (last axis); row mask broadcast over rows ---
    logits1 = jnp.where(mask_row > 0.0, s, -1e30)
    m1 = jnp.max(logits1, axis=1, keepdims=True)
    e1 = jnp.exp(logits1 - m1)
    p1 = e1 * pl.reciprocal(jnp.sum(e1, axis=1, keepdims=True), approx=True)

    # --- masked softmax over dim=1 (first axis); col mask broadcast over cols ---
    logits2 = jnp.where(mask_col > 0.0, s, -1e30)
    m2 = jnp.max(logits2, axis=0, keepdims=True)
    e2 = jnp.exp(logits2 - m2)
    p2 = e2 * pl.reciprocal(jnp.sum(e2, axis=0, keepdims=True), approx=True)

    # --- a = p1 @ c ;  b = p1 @ (p2^T @ c)  (re-associated, O(L^2*H)) ---
    a = jnp.dot(p1, c, preferred_element_type=jnp.float32)           # (L, H)
    p2t_c = lax.dot_general(p2, c, (((0,), (0,)), ((), ())),
                            preferred_element_type=jnp.float32)      # (L, H)
    b = jnp.dot(p1, p2t_c, preferred_element_type=jnp.float32)       # (L, H)

    # --- epilogue: direct slice stores, no concat temporary ---
    out_ref[0, :, 0:H] = c
    out_ref[0, :, H:2 * H] = a
    out_ref[0, :, 2 * H:3 * H] = c * a
    out_ref[0, :, 3 * H:4 * H] = c * b


def self_attention(c, c_mask, c_weight, q_weight, cq_weight, bias):
    """c: (B, L, H) f32, c_mask: (B, L) {0,1}. Returns (B, L, 4H) f32."""
    B, L, H = c.shape
    c = c.astype(jnp.float32)
    mask_col = c_mask.reshape(B, L, 1).astype(jnp.float32)
    mask_row = c_mask.reshape(B, 1, L).astype(jnp.float32)
    cwqw = jnp.concatenate(
        [c_weight.reshape(H, 1), q_weight.reshape(H, 1)],
        axis=1).astype(jnp.float32)                                  # (H, 2)
    cqw2 = cq_weight.reshape(1, H).astype(jnp.float32)
    bias2 = bias.reshape(1, 1).astype(jnp.float32)

    grid_spec = pltpu.PrefetchScalarGridSpec(
        num_scalar_prefetch=0,
        grid=(B,),
        in_specs=[
            pl.BlockSpec((1, L, H), lambda b: (b, 0, 0)),     # c
            pl.BlockSpec((1, L, 1), lambda b: (b, 0, 0)),     # mask (col layout)
            pl.BlockSpec((1, 1, L), lambda b: (b, 0, 0)),     # mask (row layout)
            pl.BlockSpec((H, 2), lambda b: (0, 0)),           # [c_weight|q_weight]
            pl.BlockSpec((1, H), lambda b: (0, 0)),           # cq_weight
            pl.BlockSpec((1, 1), lambda b: (0, 0)),           # bias
        ],
        out_specs=pl.BlockSpec((1, L, 4 * H), lambda b: (b, 0, 0)),
    )
    return pl.pallas_call(
        _self_attention_kernel,
        out_shape=jax.ShapeDtypeStruct((B, L, 4 * H), jnp.float32),
        grid_spec=grid_spec,
        compiler_params=pltpu.CompilerParams(
            dimension_semantics=("parallel",)),
    )(c, mask_col, mask_row, cwqw, cqw2, bias2)


def reference_forward(c, c_mask, c_weight, q_weight, cq_weight, bias):
    """Pure-JAX reference reproducing the PyTorch forward (eval mode)."""
    B, L, H = c.shape
    s0 = c @ c_weight                                        # (B, L, 1)
    s1 = jnp.swapaxes(c @ q_weight, 1, 2)                    # (B, 1, L)
    s2 = jnp.einsum("blh,bmh->blm", c * cq_weight.reshape(1, 1, H), c)
    s = s0 + s1 + s2 + bias.reshape(())                      # (B, L, L)
    m_row = c_mask.reshape(B, 1, L).astype(jnp.float32)
    m_col = c_mask.reshape(B, L, 1).astype(jnp.float32)
    p1 = jax.nn.softmax(m_row * s + (1 - m_row) * -1e30, axis=2)
    p2 = jax.nn.softmax(m_col * s + (1 - m_col) * -1e30, axis=1)
    a = p1 @ c
    b = (p1 @ jnp.swapaxes(p2, 1, 2)) @ c
    return jnp.concatenate([c, a, c * a, c * b], axis=2)


def xavier_uniform(key, shape, fan_in, fan_out):
    bound = float(np.sqrt(6.0 / (fan_in + fan_out)))
    return jax.random.uniform(key, shape, jnp.float32, -bound, bound)


if __name__ == "__main__":
    B, L, H = 2, 16, 32

    key = jax.random.PRNGKey(0)
    k_c, k_cw, k_qw, k_cqw = jax.random.split(key, 4)

    c = jax.random.normal(k_c, (B, L, H), dtype=jnp.float32)
    # valid lengths 16 and 12 -> deterministic 0/1 mask
    lengths = jnp.array([16, 12], dtype=jnp.int32)
    c_mask = (jnp.arange(L)[None, :] < lengths[:, None]).astype(jnp.float32)

    # Deterministic xavier-uniform parameter init (same shapes as the module).
    c_weight = xavier_uniform(k_cw, (H, 1), fan_in=1, fan_out=H)
    q_weight = xavier_uniform(k_qw, (H, 1), fan_in=1, fan_out=H)
    cq_weight = xavier_uniform(k_cqw, (1, 1, H), fan_in=H, fan_out=H)
    bias = jnp.zeros((1,), dtype=jnp.float32)

    out = self_attention(c, c_mask, c_weight, q_weight, cq_weight, bias)
    out = jax.block_until_ready(out)

    ref = reference_forward(c, c_mask, c_weight, q_weight, cq_weight, bias)
    # Tolerance loosened vs. 1e-5 because of approx EUP reciprocal in softmax.
    np.testing.assert_allclose(np.asarray(out), np.asarray(ref),
                               rtol=1e-2, atol=1e-2)
    assert out.shape == (B, L, 4 * H)
    print("KERNEL_OK")
</pallas_src>

<mosaic_0001>
module attributes {stable_mosaic.version = 11 : i64} {
  func.func @_self_attention_kernel(%arg0: i32, %arg1: memref<1x16x32xf32, #tpu.memory_space<vmem>>, %arg2: memref<1x16x1xf32, #tpu.memory_space<vmem>>, %arg3: memref<1x1x16xf32, #tpu.memory_space<vmem>>, %arg4: memref<32x2xf32, #tpu.memory_space<vmem>>, %arg5: memref<1x32xf32, #tpu.memory_space<vmem>>, %arg6: memref<1x1xf32, #tpu.memory_space<vmem>>, %arg7: memref<1x16x128xf32, #tpu.memory_space<vmem>>) attributes {dimension_semantics = [#tpu.dimension_semantics<parallel>], iteration_bounds = array<i64: 2>, scalar_prefetch = 0 : i64, scratch_operands = 0 : i64, tpu.core_type = #tpu.core_type<tc>, window_params = [{transform_indices = @transform_0, window_bounds = array<i64: 1, 16, 32>}, {transform_indices = @transform_1, window_bounds = array<i64: 1, 16, 1>}, {transform_indices = @transform_2, window_bounds = array<i64: 1, 1, 16>}, {pipeline_mode = #tpu.pipeline_mode<synchronous>, transform_indices = @transform_3, window_bounds = array<i64: 32, 2>}, {pipeline_mode = #tpu.pipeline_mode<synchronous>, transform_indices = @transform_4, window_bounds = array<i64: 1, 32>}, {pipeline_mode = #tpu.pipeline_mode<synchronous>, transform_indices = @transform_5, window_bounds = array<i64: 1, 1>}, {transform_indices = @transform_6, window_bounds = array<i64: 1, 16, 128>}]} {
    %c0 = arith.constant 0 : index
    %c0_0 = arith.constant 0 : index
    %c0_1 = arith.constant 0 : index
    %0 = vector.load %arg1[%c0, %c0_0, %c0_1] : memref<1x16x32xf32, #tpu.memory_space<vmem>>, vector<1x16x32xf32>
    %1 = vector.shape_cast %0 : vector<1x16x32xf32> to vector<16x32xf32>
    %c0_2 = arith.constant 0 : index
    %c0_3 = arith.constant 0 : index
    %c0_4 = arith.constant 0 : index
    %2 = vector.load %arg2[%c0_2, %c0_3, %c0_4] : memref<1x16x1xf32, #tpu.memory_space<vmem>>, vector<1x16x1xf32>
    %3 = vector.shape_cast %2 : vector<1x16x1xf32> to vector<16x1xf32>
    %c0_5 = arith.constant 0 : index
    %c0_6 = arith.constant 0 : index
    %c0_7 = arith.constant 0 : index
    %4 = vector.load %arg3[%c0_5, %c0_6, %c0_7] : memref<1x1x16xf32, #tpu.memory_space<vmem>>, vector<1x1x16xf32>
    %5 = vector.shape_cast %4 : vector<1x1x16xf32> to vector<1x16xf32>
    %c0_8 = arith.constant 0 : index
    %c0_9 = arith.constant 0 : index
    %6 = vector.load %arg4[%c0_8, %c0_9] : memref<32x2xf32, #tpu.memory_space<vmem>>, vector<32x2xf32>
    %c0_10 = arith.constant 0 : index
    %c0_11 = arith.constant 0 : index
    %7 = vector.load %arg5[%c0_10, %c0_11] : memref<1x32xf32, #tpu.memory_space<vmem>>, vector<1x32xf32>
    %c0_12 = arith.constant 0 : index
    %c0_13 = arith.constant 0 : index
    %8 = vector.load %arg6[%c0_12, %c0_13] : memref<1x1xf32, #tpu.memory_space<vmem>>, vector<1x1xf32>
    %9 = vector.extract %8[0, 0] : f32 from vector<1x1xf32>
    %cst = arith.constant dense<0.000000e+00> : vector<16x2xf32>
    %10 = tpu.matmul %1, %6, %cst {dimension_numbers = #tpu.dot_dimension_numbers<[1], [0], [0], [1], [0, 0, 1, 1], [], []>} : vector<16x32xf32>, vector<32x2xf32>, vector<16x2xf32> -> vector<16x2xf32>
    %11 = vector.extract_strided_slice %10 {offsets = [0, 0], sizes = [16, 1], strides = [1, 1]} : vector<16x2xf32> to vector<16x1xf32>
    %12 = vector.extract_strided_slice %10 {offsets = [0, 1], sizes = [16, 1], strides = [1, 1]} : vector<16x2xf32> to vector<16x1xf32>
    %13 = tpu.transpose %12, [1, 0] : vector<16x1xf32> -> vector<1x16xf32>
    %14 = vector.broadcast %9 : f32 to vector<1x16xf32>
    %15 = arith.addf %13, %14 : vector<1x16xf32>
    %16 = vector.broadcast %7 : vector<1x32xf32> to vector<16x32xf32>
    %17 = arith.mulf %1, %16 : vector<16x32xf32>
    %cst_14 = arith.constant dense<0.000000e+00> : vector<16x16xf32>
    %18 = tpu.matmul %17, %1, %cst_14 {dimension_numbers = #tpu.dot_dimension_numbers<[1], [1], [0], [0], [0, 0, 1, 0], [], []>} : vector<16x32xf32>, vector<16x32xf32>, vector<16x16xf32> -> vector<16x16xf32>
    %19 = vector.broadcast %11 : vector<16x1xf32> to vector<16x16xf32>
    %20 = arith.addf %18, %19 : vector<16x16xf32>
    %21 = vector.broadcast %15 : vector<1x16xf32> to vector<16x16xf32>
    %22 = arith.addf %20, %21 : vector<16x16xf32>
    %cst_15 = arith.constant 0.000000e+00 : f32
    %23 = vector.broadcast %cst_15 : f32 to vector<1x16xf32>
    %24 = arith.cmpf ogt, %5, %23 : vector<1x16xf32>
    %cst_16 = arith.constant -1.000000e+30 : f32
    %25 = vector.shape_cast %24 : vector<1x16xi1> to vector<1x16xi1>
    %26 = vector.broadcast %25 : vector<1x16xi1> to vector<16x16xi1>
    %27 = vector.broadcast %cst_16 : f32 to vector<16x16xf32>
    %28 = arith.select %26, %22, %27 : vector<16x16xi1>, vector<16x16xf32>
    %cst_17 = arith.constant dense<0xFF800000> : vector<16xf32>
    %29 = vector.multi_reduction <maximumf>, %28, %cst_17 [1] : vector<16x16xf32> to vector<16xf32>
    %30 = vector.shape_cast %29 : vector<16xf32> to vector<16x1xf32>
    %31 = vector.broadcast %30 : vector<16x1xf32> to vector<16x16xf32>
    %32 = arith.subf %28, %31 : vector<16x16xf32>
    %33 = math.exp %32 : vector<16x16xf32>
    %cst_18 = arith.constant dense<0.000000e+00> : vector<16xf32>
    %34 = vector.multi_reduction <add>, %33, %cst_18 [1] : vector<16x16xf32> to vector<16xf32>
    %35 = vector.shape_cast %34 : vector<16xf32> to vector<16x1xf32>
    %36 = tpu.reciprocal %35 {approx = true} : vector<16x1xf32> -> vector<16x1xf32>
    %37 = vector.broadcast %36 : vector<16x1xf32> to vector<16x16xf32>
    %38 = arith.mulf %33, %37 : vector<16x16xf32>
    %cst_19 = arith.constant 0.000000e+00 : f32
    %39 = vector.broadcast %cst_19 : f32 to vector<16x1xf32>
    %40 = arith.cmpf ogt, %3, %39 : vector<16x1xf32>
    %cst_20 = arith.constant -1.000000e+30 : f32
    %41 = vector.shape_cast %40 : vector<16x1xi1> to vector<16x1xi1>
    %42 = vector.broadcast %41 : vector<16x1xi1> to vector<16x16xi1>
    %43 = vector.broadcast %cst_20 : f32 to vector<16x16xf32>
    %44 = arith.select %42, %22, %43 : vector<16x16xi1>, vector<16x16xf32>
    %cst_21 = arith.constant dense<0xFF800000> : vector<16xf32>
    %45 = vector.multi_reduction <maximumf>, %44, %cst_21 [0] : vector<16x16xf32> to vector<16xf32>
    %46 = vector.shape_cast %45 : vector<16xf32> to vector<1x16xf32>
    %47 = vector.broadcast %46 : vector<1x16xf32> to vector<16x16xf32>
    %48 = arith.subf %44, %47 : vector<16x16xf32>
    %49 = math.exp %48 : vector<16x16xf32>
    %cst_22 = arith.constant dense<0.000000e+00> : vector<16xf32>
    %50 = vector.multi_reduction <add>, %49, %cst_22 [0] : vector<16x16xf32> to vector<16xf32>
    %51 = vector.shape_cast %50 : vector<16xf32> to vector<1x16xf32>
    %52 = tpu.reciprocal %51 {approx = true} : vector<1x16xf32> -> vector<1x16xf32>
    %53 = vector.broadcast %52 : vector<1x16xf32> to vector<16x16xf32>
    %54 = arith.mulf %49, %53 : vector<16x16xf32>
    %cst_23 = arith.constant dense<0.000000e+00> : vector<16x32xf32>
    %55 = tpu.matmul %38, %1, %cst_23 {dimension_numbers = #tpu.dot_dimension_numbers<[1], [0], [0], [1], [0, 0, 1, 1], [], []>} : vector<16x16xf32>, vector<16x32xf32>, vector<16x32xf32> -> vector<16x32xf32>
    %cst_24 = arith.constant dense<0.000000e+00> : vector<16x32xf32>
    %56 = tpu.matmul %54, %1, %cst_24 {dimension_numbers = #tpu.dot_dimension_numbers<[0], [0], [1], [1], [0, 1, 1, 1], [], []>} : vector<16x16xf32>, vector<16x32xf32>, vector<16x32xf32> -> vector<16x32xf32>
    %cst_25 = arith.constant dense<0.000000e+00> : vector<16x32xf32>
    %57 = tpu.matmul %38, %56, %cst_25 {dimension_numbers = #tpu.dot_dimension_numbers<[1], [0], [0], [1], [0, 0, 1, 1], [], []>} : vector<16x16xf32>, vector<16x32xf32>, vector<16x32xf32> -> vector<16x32xf32>
    %c0_26 = arith.constant 0 : index
    %c0_27 = arith.constant 0 : index
    %c0_28 = arith.constant 0 : index
    %58 = vector.load %arg7[%c0_26, %c0_27, %c0_28] : memref<1x16x128xf32, #tpu.memory_space<vmem>>, vector<1x16x32xf32>
    %59 = vector.shape_cast %58 : vector<1x16x32xf32> to vector<16x32xf32>
    %60 = vector.shape_cast %1 : vector<16x32xf32> to vector<1x16x32xf32>
    tpu.vector_store %arg7[%c0_26, %c0_27, %c0_28], %60 {strides = array<i32>} : memref<1x16x128xf32, #tpu.memory_space<vmem>>, vector<1x16x32xf32>,
    %c0_29 = arith.constant 0 : index
    %c0_30 = arith.constant 0 : index
    %c32 = arith.constant 32 : index
    %61 = vector.load %arg7[%c0_29, %c0_30, %c32] : memref<1x16x128xf32, #tpu.memory_space<vmem>>, vector<1x16x32xf32>
    %62 = vector.shape_cast %61 : vector<1x16x32xf32> to vector<16x32xf32>
    %63 = vector.shape_cast %55 : vector<16x32xf32> to vector<1x16x32xf32>
    tpu.vector_store %arg7[%c0_29, %c0_30, %c32], %63 {strides = array<i32>} : memref<1x16x128xf32, #tpu.memory_space<vmem>>, vector<1x16x32xf32>,
    %64 = arith.mulf %1, %55 : vector<16x32xf32>
    %c0_31 = arith.constant 0 : index
    %c0_32 = arith.constant 0 : index
    %c64 = arith.constant 64 : index
    %65 = vector.load %arg7[%c0_31, %c0_32, %c64] : memref<1x16x128xf32, #tpu.memory_space<vmem>>, vector<1x16x32xf32>
    %66 = vector.shape_cast %65 : vector<1x16x32xf32> to vector<16x32xf32>
    %67 = vector.shape_cast %64 : vector<16x32xf32> to vector<1x16x32xf32>
    tpu.vector_store %arg7[%c0_31, %c0_32, %c64], %67 {strides = array<i32>} : memref<1x16x128xf32, #tpu.memory_space<vmem>>, vector<1x16x32xf32>,
    %68 = arith.mulf %1, %57 : vector<16x32xf32>
    %c0_33 = arith.constant 0 : index
    %c0_34 = arith.constant 0 : index
    %c96 = arith.constant 96 : index
    %69 = vector.load %arg7[%c0_33, %c0_34, %c96] : memref<1x16x128xf32, #tpu.memory_space<vmem>>, vector<1x16x32xf32>
    %70 = vector.shape_cast %69 : vector<1x16x32xf32> to vector<16x32xf32>
    %71 = vector.shape_cast %68 : vector<16x32xf32> to vector<1x16x32xf32>
    tpu.vector_store %arg7[%c0_33, %c0_34, %c96], %71 {strides = array<i32>} : memref<1x16x128xf32, #tpu.memory_space<vmem>>, vector<1x16x32xf32>,
    return
  }
  func.func @transform_0(%arg0: i32) -> (i32, i32, i32) {
    %c0_i32 = arith.constant 0 : i32
    %c0_i32_0 = arith.constant 0 : i32
    %c0_i32_1 = arith.constant 0 : i32
    return %arg0, %c0_i32, %c0_i32_0 : i32, i32, i32
  }
  func.func @transform_1(%arg0: i32) -> (i32, i32, i32) {
    %c0_i32 = arith.constant 0 : i32
    %c0_i32_0 = arith.constant 0 : i32
    %c0_i32_1 = arith.constant 0 : i32
    return %arg0, %c0_i32, %c0_i32_0 : i32, i32, i32
  }
  func.func @transform_2(%arg0: i32) -> (i32, i32, i32) {
    %c0_i32 = arith.constant 0 : i32
    %c0_i32_0 = arith.constant 0 : i32
    %c0_i32_1 = arith.constant 0 : i32
    return %arg0, %c0_i32, %c0_i32_0 : i32, i32, i32
  }
  func.func @transform_3(%arg0: i32) -> (i32, i32) {
    %c0_i32 = arith.constant 0 : i32
    %c0_i32_0 = arith.constant 0 : i32
    %c0_i32_1 = arith.constant 0 : i32
    return %c0_i32, %c0_i32_0 : i32, i32
  }
  func.func @transform_4(%arg0: i32) -> (i32, i32) {
    %c0_i32 = arith.constant 0 : i32
    %c0_i32_0 = arith.constant 0 : i32
    %c0_i32_1 = arith.constant 0 : i32
    return %c0_i32, %c0_i32_0 : i32, i32
  }
  func.func @transform_5(%arg0: i32) -> (i32, i32) {
    %c0_i32 = arith.constant 0 : i32
    %c0_i32_0 = arith.constant 0 : i32
    %c0_i32_1 = arith.constant 0 : i32
    return %c0_i32, %c0_i32_0 : i32, i32
  }
  func.func @transform_6(%arg0: i32) -> (i32, i32, i32) {
    %c0_i32 = arith.constant 0 : i32
    %c0_i32_0 = arith.constant 0 : i32
    %c0_i32_1 = arith.constant 0 : i32
    return %arg0, %c0_i32, %c0_i32_0 : i32, i32, i32
  }
}

</mosaic_0001>

<bundles_post_ra>
// kernel: tpu_custom_call.1
= control target key start
LH: loop header
LB: loop body
LE: loop exit
PB: predicated region body
PF: predicated region fallthrough
CT: control target
= control target key end

     0   :  { %s1476_s0 = inlined_call_operand.vmem [shape: f32[2,16,32], index: 0, kind: input, shape index: {}]   ;;  %s1477_s1 = inlined_call_operand.vmem [shape: f32[2,16,1], index: 1, kind: input, shape index: {}]   ;;  %s1478_s2 = inlined_call_operand.vmem [shape: f32[2,1,16], index: 2, kind: input, shape index: {}]   ;;  %s1479_s3 = inlined_call_operand.vmem [shape: f32[32,2], index: 3, kind: input, shape index: {}]   ;;  %s1480_s4 = inlined_call_operand.vmem [shape: f32[1,32], index: 4, kind: input, shape index: {}]   ;;  %s1481_s5 = inlined_call_operand.<no memory space> [shape: f32[1,1], index: 5, kind: input, shape index: {}]   ;;  %s1482_s6 = inlined_call_operand.hbm [shape: f32[2,16,128], index: 6, kind: output, shape index: {}]  }
   0x1   :  { %v11_v0 = vstv %s1481_s5 }
   0x2   :  { %12 = vst [vmem:[#allocation2] sm:$0x1] %v11_v0 }
   0x3   :  { %13 = vsyncpa [#allocation4], 0 }
   0x4   :  { %15 = vsyncpa [#allocation4 + $0x1], 0  ;;  %s1295_s23 = smov 0   ;;  %s1297_s24 = smov 0  }
   0x5   :  { %s1299_s25 = smov 0   ;;  %s1301_s26 = smov 0  }
   0x6 LB: > { %s1316_s5 = sadd.s32 4294967295, %s1247_s26   ;;  %s1003_s27 = sadd.s32 4294967294, %s1247_s26   ;;  %s1247_s26 = sphi %s1301_s26, %s1488_s26   ;;  %s1243_s25 = sphi %s1299_s25, %s1487_s25   ;;  %s1239_s24 = sphi %s1297_s24, %s1486_s24   ;;  %s1235_s23 = sphi %s1295_s23, %s1485_s23  }
   0x7   : > { %s1320_s28 = sadd.s32 1, %s1247_s26   ;;  %s169_s29 = sadd.s32 1, %s1243_s25 }
   0x8   : > { %s166_s30 = ssub.s32 %s1247_s26, %s1320_s28  ;;  %p179_p0 = scmp.ne.s32.totalorder %s1243_s25, %s1239_s24 }
   0x9   : > { %p167_p1 = scmp.eq.s32.totalorder %s166_s30, 0  ;;  %p180_p2 = scmp.eq.s32.totalorder %s1316_s5, 1 }
   0xa   : > { %p185_p3 = scmp.ne.s32.totalorder %s1239_s24, %s1235_s23  ;;  %p186_p4 = scmp.eq.s32.totalorder %s1003_s27, 1 }
   0xb   : > { %s1331_s7 = scalar_select %p167_p1, %s1243_s25, %s169_s29  }
   0xc   : > { %p1333_p5 = por %p180_p2, %p179_p0  ;;  %p1337_p6 = por %p186_p4, %p185_p3 }
   0xd   : > { %p1006_p7 = scmp.ge.s32.totalorder %s1247_s26, 1  ;;  %p235_p8 = scmp.lt.s32.totalorder %s1247_s26, 3 }
   0xf   : > { %p236_p9 = pnand %p1006_p7, %p235_p8 }
  0x10   : > { %v291_v1 = vld [vmem:[%s1479_s3] sm:$0xff] (!%p236_p9)  ;;  %v292_v2 = vld [vmem:[%s1479_s3 + $0x8] sm:$0xff] (!%p236_p9)  ;;  %v293_v3 = vld [vmem:[%s1479_s3 + $0x10] sm:$0xff] (!%p236_p9)  ;;  %p273_p10 = scmp.lt.s32.totalorder (!%p236_p9), %s1316_s5, 1  ;;  %v1249_v7 = vmov (!%p236_p9), 0   ;;  %vm298_vm0 = vcmask (!%p236_p9), 261120   ;;  %v519_v26 = vlaneseq (!%p236_p9) }
  0x11   : > { %239 = sbr.rel (%p236_p9) target bundleno = 1267 (0x4f3), region = 44  ;;  %v1094_v4 = vpack.c.bf16 (!%p236_p9), %v292_v2, %v291_v1  ;;  %v294_v5 = vld [vmem:[%s1479_s3 + $0x18] sm:$0xff] (!%p236_p9)  ;;  %1169 = vset.pattern.permute.xlu1 (!%p236_p9), %v1249_v7  ;;  %1170 = vset.pattern.permute.xlu0 (!%p236_p9), %v1249_v7  ;;  %v1014_v8 = vld [vmem:[%s1480_s4] ss:$0 sm:$0xff] (!%p236_p9)  ;;  %vm1103_vm1 = vmpackc.low (!%p236_p9), %vm298_vm0, %vm298_vm0  ;;  %s1250_s12 = smov (!%p236_p9), 127   ;;  %vm534_vm7 = vcmask (!%p236_p9), 130048  }
  0x12   : > { %v1098_v6 = vpack.c.bf16 (!%p236_p9), %v294_v5, %v293_v3  ;;  %v296_v22 = vld [vmem:[#allocation2] sm:$0x1] (!%p236_p9)  ;;  %v520_v29 = vshrl.u32 (!%p236_p9), %v519_v26, 7  ;;  %s270_s17 = sand.u32 (!%p236_p9), 1, %s1239_s24   ;;  %s1251_s20 = smov (!%p236_p9), 32   ;;  %vm877_vm9 = vcmask (!%p236_p9), 523520  }
  0x13   : > { %1095 = vmatprep.subr.bf16.mxu0 (!%p236_p9), %v1094_v4  ;;  %1120 = vpush (!%p236_p9), %v296_v22  ;;  %s1252_s21 = smov (!%p236_p9), 64   ;;  %s1253_s22 = smov (!%p236_p9), 96   ;;  %vm890_vm10 = vcmask (!%p236_p9), 785920   ;;  %vm903_vm11 = vcmask (!%p236_p9), 1048320  }
  0x14   : > { %1097 = vmatpush3.bf16.msra.mxu0 (!%p236_p9), %v1094_v4  ;;  %v521_v31 = vsub.s32 (!%p236_p9), 0, %v520_v29  ;;  %s1032_s27 = sshll.u32 (!%p236_p9), %s1316_s5, 8  ;;  %s1254_s13 = smov (!%p236_p9), [#allocation3]  }
  0x15   : > { %1099 = vmatprep.subr.bf16.mxu0 (!%p236_p9), %v1098_v6  ;;  %s1189_s14 = sshll.u32 (!%p236_p9), %s1254_s13, 4  ;;  %s1190_s14 = int_to_ptr.vmem [resolvable:$false] %s1189_s14 }
  0x18   : > { %s1357_s18 = scalar_select %p273_p10, %s1316_s5, 1  ;;  %1101 = vmatpush3.bf16.msra.mxu0 %v1098_v6 }
  0x19   : > { %s1435_s5 = scalar_lea.sflag [#allocation4], %s270_s17 }
  0x1a   : > { %s1030_s19 = sshll.u32 %s1357_s18, 4  ;;  %s285_s15 = scalar_lea.vmem %s1478_s2, %s1357_s18 }
  0x1b   : > { %s277_s29 = scalar_lea.vmem %s1476_s0, %s1030_s19  ;;  %s282_s11 = scalar_lea.vmem %s1477_s1, %s1030_s19  ;;  %v290_v28 = vld [vmem:[%s285_s15] sm:$0x1] }
  0x1c   : > { %v1366_v9 = vld [vmem:[%s277_s29] sm:$0xff]  ;;  %v1368_v10 = vld [vmem:[%s277_s29 + $0x8] sm:$0xff]  ;;  %vm525_vm4 = vcmp.gt.f32.partialorder %v290_v28, 0.0  ;;  %s1007_s18 = sshll.u32 %s270_s17, 4  ;;  %s1191_s15 = scalar_lea.vmem %s1190_s14, 512 }
  0x1d   : > { %1063 = vmatprep.mubr.msk.f32.mxu0 %vm298_vm0, %v1366_v9  ;;  %v1102_v11 = vpack.c.bf16 %v1368_v10, %v1366_v9  ;;  %v428_v12 = vmul.f32 %v1014_v8, %v1366_v9  ;;  %v429_v13 = vmul.f32 %v1014_v8, %v1368_v10  ;;  %v289_v14 = vld [vmem:[%s282_s11 + $0x8] sm:$0xff]  ;;  %v288_v17 = vld [vmem:[%s282_s11] sm:$0xff]  ;;  %v526_v32 = vsel %vm525_vm4, 1, %v1249_v7  ;;  %s1406_s19 = scalar_lea.vmem [#allocation3], %s1007_s18  ;;  %s1427_s11 = scalar_lea.hbm %s1482_s6, %s1032_s27 }
  0x1e   : > { %1064 = vmatmul.mubr.msk.f32.vlgmr.msra.gmra.mrb[0].mxu0 %vm298_vm0, %v1368_v10  ;;  %vm558_vm2 = vcmp.gt.f32.partialorder %v289_v14, 0.0  ;;  %vm557_vm3 = vcmp.gt.f32.partialorder %v288_v17, 0.0  ;;  %v530_v35 = vrot.slane %v526_v32, %v521_v31  ;;  %868 = vst.msk [vmem:[%s1406_s19 + $0x8] sm:$0xff] %vm298_vm0, %v1368_v10  ;;  %867 = vst.msk [vmem:[%s1406_s19] sm:$0xff] %vm298_vm0, %v1366_v9  ;;  %s920_s29 = sshll.u32 %s1406_s19, 4  ;;  %s1429_s29 = int_to_ptr.vmem [resolvable:$true] %s920_s29 }
  0x1f   : > { %1104 = vmatprep.subr.msk.bf16.mxu1 %vm1103_vm1, %v1102_v11  ;;  %1070 = vmatprep.mubr.msk.f32.mxu1 %vm298_vm0, %v428_v12  ;;  %v560_v18 = vsel %vm558_vm2, 1, %v1249_v7  ;;  %v559_v20 = vsel %vm557_vm3, 1, %v1249_v7  ;;  %p1192_p0 = scmp.lt.s32.totalorder %s1429_s29, %s1190_s14 }
  0x20   : > { %1107 = vmatpush3.bf16.xpose.msk.msra.mxu1 %vm1103_vm1, %v1102_v11  ;;  %1109 = vmatprep.subr.bf16.mxu0 %v1102_v11  ;;  %vm531_vm6 = vcmp.eq.s32.totalorder %v530_v35, 1 }
  0x21   : > { %1113 = vmatprep.subr.bf16.mxu1 %v1102_v11  ;;  %1111 = vmatpush3.bf16.msra.mxu0 %v1102_v11 }
  0x27   : > { %1071 = vmatmul.mubr.msk.f32.vlgmr.msra.gmra.mrb[0].mxu1 %vm298_vm0, %v429_v13 }
  0x28   : > { %1115 = vmatpush3.bf16.msra.mxu1 %v1102_v11 }
  0x44   : > { %s1121_s16 = spop %1120 }
  0x45   : > { %v420_v33 = vstv %s1121_s16 }
  0xf1   : > { %v1065_v15 = vpop.f32.mrb[0].mxu0 }
  0xf2   : > { %435 = vperm.xlu1 %1169, %v1065_v15   ;;  %v371_v16 = vpop.f32.mrb[1].mxu0 }
  0xf3   : > { %382 = vrot.lane.b32.xlu0 %v371_v16, %s1250_s12 }
  0xf6   : > { %565 = vperm.xlu1 %1169, %v560_v18  }
  0xf7   : > { %384 = vrot.lane.b32.xlu0 %v1065_v15, %s1250_s12  ;;  %s1185_s12 = scalar_lea.vmem %s1429_s29, 256 }
  0xf8   : > { %p1186_p11 = scmp.ne.s32.totalorder %s1429_s29, %s1185_s12  ;;  %p1193_p1 = scmp.lt.s32.totalorder %s1191_s15, %s1185_s12 }
  0xfa   : > { %v1072_v19 = vpop.f32.mrb[0].mxu1  ;;  %431 = vperm.xlu1 %1169, %v371_v16   ;;  %p1187_p12 = pnand %p1186_p11, %p1333_p5  ;;  %p1194_p2 = por %p1193_p1, %p1192_p0 }
  0xfb   : > { %v510_v21 = vpop.f32.mrb[1].mxu1  ;;  %562 = vperm.xlu0 %1170, %v559_v20  }
  0xfc   : > { %p1188_p13 = pneg %p1187_p12 }
  0xfe   : > { %p1195_p3 = pnand %p1194_p2, %p1188_p13 }
 0x165   : > { %v383_v23 = vpop.permute.xlu0 %382 }
 0x166   : > { %388 = vxpose.xlu1.b32.start [1/2] (short) (narrow) %v383_v23, 8 }
 0x169   : > { %v385_v24 = vpop.permute.xlu0 %384 }
 0x16a   : > { %389 = vxpose.xlu1.b32.end [2/2] (short) (narrow) %v385_v24, 8 }
 0x171   : > { %v436_v25 = vpop.permute.xlu1 %435 }
 0x172   : > { %v516_v38 = vadd.f32 %v1072_v19, %v436_v25 }
 0x175   : > { %v566_v27 = vpop.permute.xlu1 %565 }
 0x176   : > { %vm568_vm8 = vcmp.eq.s32.totalorder %v566_v27, 1 }
 0x179   : > { %v432_v30 = vpop.permute.xlu1 %431 }
 0x17a   : > { %v563_v37 = vpop.permute.xlu0 %562  ;;  %v511_v39 = vadd.f32 %v510_v21, %v432_v30 }
 0x17b   : > { %vm567_vm5 = vcmp.eq.s32.totalorder %v563_v37, 1 }
 0x1e6   : > { %v404_v34 = vpop.trf.xlu1 }
 0x1e7   : > { %v421_v36 = vadd.f32 %v420_v33, %v404_v34 }
 0x1e9   : > { %v522_v40 = vrot.slane %v421_v36, %v521_v31 }
 0x1eb   : > { %v524_v41 = vadd.f32 %v522_v40, %v516_v38  ;;  %v523_v42 = vadd.f32 %v522_v40, %v511_v39 }
 0x1ed   : > { %v570_v43 = vsel %vm568_vm8, %v524_v41, -1e+30  ;;  %v569_v44 = vsel %vm567_vm5, %v523_v42, -1e+30  ;;  %v533_v45 = vsel %vm531_vm6, %v524_v41, -1e+30 }
 0x1ee   : > { %v572_v46 = vsel %vm534_vm7, %v570_v43, -inf  ;;  %v571_v47 = vsel %vm534_vm7, %v569_v44, -inf  ;;  %v538_v48 = vsel %vm534_vm7, %v533_v45, -inf  ;;  %v532_v49 = vsel %vm531_vm6, %v523_v42, -1e+30 }
 0x1ef   : > { %v573_v50 = vmax.f32 %v571_v47, %v572_v46  ;;  %539 = vmax.xlane.f32.xlu1 %v538_v48  ;;  %v535_v13 = vsel %vm534_vm7, %v532_v49, -inf }
 0x1f1   : > { %v574_v51 = vrot.slane %v573_v50, 4 }
 0x1f3   : > { %v575_v52 = vmax.f32 %v573_v50, %v574_v51 }
 0x1f5   : > { %v576_v53 = vrot.slane %v575_v52, 2 }
 0x1f7   : > { %v577_v54 = vmax.f32 %v575_v52, %v576_v53 }
 0x1f9   : > { %v578_v55 = vrot.slane %v577_v54, 1 }
 0x1fb   : > { %v579_v56 = vmax.f32 %v577_v54, %v578_v55 }
 0x1fd   : > { %v580_v57 = vsub.f32 %v569_v44, %v579_v56  ;;  %v581_v58 = vsub.f32 %v570_v43, %v579_v56 }
 0x1ff   : > { %v582_v59 = vmul.f32 1.442695, %v580_v57  ;;  %v584_v60 = vmul.f32 1.442695, %v581_v58 }
 0x201   : > { %1171 = vpow2.f32 %v582_v59 }
 0x202   : > { %1173 = vpow2.f32 %v584_v60 }
 0x20b   : > { %v1172_v61 = vpop.eup %1171 }
 0x20c   : > { %v1174_v62 = vpop.eup %1173  ;;  %v586_v63 = vsel %vm534_vm7, %v1172_v61, 0.0 }
 0x20d   : > { %v587_v0 = vsel %vm534_vm7, %v1174_v62, 0.0 }
 0x20e   : > { %v588_v1 = vadd.f32 %v587_v0, %v586_v63 }
 0x210   : > { %v589_v2 = vrot.slane %v588_v1, 4 }
 0x212   : > { %v590_v3 = vadd.f32 %v589_v2, %v588_v1 }
 0x214   : > { %v591_v4 = vrot.slane %v590_v3, 2 }
 0x216   : > { %v592_v5 = vadd.f32 %v591_v4, %v590_v3 }
 0x218   : > { %v593_v6 = vrot.slane %v592_v5, 1 }
 0x21a   : > { %v594_v7 = vadd.f32 %v593_v6, %v592_v5 }
 0x21c   : > { %1175 = vrcp.f32 %v594_v7 }
 0x226   : > { %v1176_v8 = vpop.eup %1175 }
 0x227   : > { %v596_v11 = vmul.f32 %v1176_v8, %v1172_v61  ;;  %v597_v12 = vmul.f32 %v1176_v8, %v1174_v62 }
 0x229   : > { %679 = vxpose.xlu0.b32.start [1/2] (short) (narrow) %v596_v11, 16 }
 0x22d   : > { %680 = vxpose.xlu0.b32.end [2/2] (short) (narrow) %v597_v12, 16 }
 0x25a   : > { %536 = vmax.xlane.f32.xlu0 %v535_v13 }
 0x27c   : > { %v540_v14 = vpop.xlane.xlu1 %539 }
 0x27d   : > { %v542_v15 = vsub.f32 %v533_v45, %v540_v14 }
 0x27f   : > { %v545_v16 = vmul.f32 1.442695, %v542_v15 }
 0x281   : > { %1177 = vpow2.f32 %v545_v16 }
 0x28b   : > { %v1178_v17 = vpop.eup %1177 }
 0x28c   : > { %v550_v18 = vsel %vm534_vm7, %v1178_v17, 0.0 }
 0x28d   : > { %551 = vadd.xlane.f32.xlu1 %v550_v18 }
 0x2a9   : > { %v695_v19 = vpop.trf.xlu0 }
 0x2aa   : > { %1084 = vmatprep.mubr.msk.f32.mxu1 %vm534_vm7, %v695_v19 }
 0x2ad   : > { %v696_v20 = vpop.trf.xlu0 }
 0x2ae   : > { %1085 = vmatmul.mubr.msk.f32.vlgmr.msra.gmra.mrb[2].mxu1 %vm534_vm7, %v696_v20 }
 0x2e7   : > { %v537_v21 = vpop.xlane.xlu0 %536 }
 0x2e8   : > { %v541_v22 = vsub.f32 %v532_v49, %v537_v21 }
 0x2ea   : > { %v543_v23 = vmul.f32 1.442695, %v541_v22 }
 0x2ec   : > { %1179 = vpow2.f32 %v543_v23 }
 0x2f6   : > { %v1180_v24 = vpop.eup %1179 }
 0x2f7   : > { %v547_v25 = vsel %vm534_vm7, %v1180_v24, 0.0 }
 0x2f8   : > { %548 = vadd.xlane.f32.xlu0 %v547_v25 }
 0x31a   : > { %v552_v27 = vpop.xlane.xlu1 %551 }
 0x31b   : > { %1181 = vrcp.f32 %v552_v27 }
 0x325   : > { %v1182_v31 = vpop.eup %1181 }
 0x326   : > { %v556_v34 = vmul.f32 %v1182_v31, %v1178_v17 }
 0x381   : > { %v1086_v26 = vpop.f32.mrb[2].mxu1 }
 0x382   : > { %v783_v28 = vpop.f32.mrb[3].mxu1 }
 0x383   : > { %v1116_v29 = vpack.c.bf16 %v1086_v26, %v783_v28 }
 0x385   : > { %v549_v30 = vpop.xlane.xlu0 %548  ;;  %1117 = vmatprep.subr.bf16.mxu0 %v1116_v29 }
 0x386   : > { %1183 = vrcp.f32 %v549_v30 }
 0x390   : > { %v1184_v32 = vpop.eup %1183 }
 0x391   : > { %v555_v33 = vmul.f32 %v1184_v32, %v1180_v24 }
 0x393   : > { %1077 = vmatprep.mubr.msk.f32.mxu0 %vm534_vm7, %v555_v33 }
 0x394   : > { %1078 = vmatmul.mubr.msk.f32.vlgmr.msra.gmra.mrb[2].mxu0 %vm534_vm7, %v556_v34 }
 0x395   : > { %1119 = vmatpush3.bf16.msra.mxu0 %v1116_v29  ;;  %1091 = vmatprep.mubr.msk.f32.mxu0 %vm534_vm7, %v555_v33 }
 0x398   : > { %1092 = vmatmul.mubr.msk.f32.vlgmr.msra.gmra.mrb[4].mxu0 %vm534_vm7, %v556_v34 }
 0x467   : > { %v1079_v35 = vpop.f32.mrb[2].mxu0 }
 0x468   : > { %873 = vrot.lane.b32.xlu1 %v1079_v35, %s1251_s20  ;;  %v670_v36 = vpop.f32.mrb[3].mxu0  ;;  %v881_v38 = vmul.f32 %v1079_v35, %v1368_v10 }
 0x469   : > { %v880_v37 = vmul.f32 %v670_v36, %v1366_v9  ;;  %871 = vrot.lane.b32.xlu0 %v670_v36, %s1251_s20 }
 0x46b   : > { %v1093_v39 = vpop.f32.mrb[4].mxu0 }
 0x46c   : > { %884 = vrot.lane.b32.xlu1 %v880_v37, %s1252_s21  ;;  %v858_v40 = vpop.f32.mrb[5].mxu0  ;;  %v894_v42 = vmul.f32 %v1093_v39, %v1368_v10 }
 0x46d   : > { %v893_v41 = vmul.f32 %v858_v40, %v1366_v9  ;;  %886 = vrot.lane.b32.xlu0 %v881_v38, %s1252_s21 }
 0x470   : > { %897 = vrot.lane.b32.xlu1 %v893_v41, %s1253_s22 }
 0x471   : > { %899 = vrot.lane.b32.xlu0 %v894_v42, %s1253_s22 }
 0x4da   : > { %v874_v43 = vpop.permute.xlu1 %873 }
 0x4db   : > { %879 = vst.msk [vmem:[%s1406_s19 + $0x8] sm:$0xff] %vm877_vm9, %v874_v43  ;;  %v872_v44 = vpop.permute.xlu0 %871 }
 0x4dc   : > { %878 = vst.msk [vmem:[%s1406_s19] sm:$0xff] %vm877_vm9, %v872_v44 }
 0x4de   : > { %v885_v45 = vpop.permute.xlu1 %884 }
 0x4df   : > { %891 = vst.msk [vmem:[%s1406_s19] sm:$0xff] %vm890_vm10, %v885_v45  ;;  %v887_v9 = vpop.permute.xlu0 %886 }
 0x4e0   : > { %892 = vst.msk [vmem:[%s1406_s19 + $0x8] sm:$0xff] %vm890_vm10, %v887_v9 }
 0x4e2   : > { %v898_v10 = vpop.permute.xlu1 %897 }
 0x4e3   : > { %904 = vst.msk [vmem:[%s1406_s19] sm:$0xff] %vm903_vm11, %v898_v10  ;;  %v900_v46 = vpop.permute.xlu0 %899 }
 0x4e4   : > { %905 = vst.msk [vmem:[%s1406_s19 + $0x8] sm:$0xff] %vm903_vm11, %v900_v46 }
 0x4e5   : > { %1198 = shalt.err (!%p1195_p3)
}
 0x4e6   : > { %s1199_s16 = scalar_lea.hbm %s1427_s11, 256  ;;  %s1203_s19 = scalar_lea.hbm %s1482_s6, 512 }
 0x4e7   : > { %p1200_p4 = scmp.ne.s32.totalorder %s1427_s11, %s1199_s16  ;;  %p1204_p9 = scmp.lt.u32.totalorder %s1427_s11, %s1482_s6 }
 0x4e8   : > { %p1205_p10 = scmp.lt.u32.totalorder %s1203_s19, %s1199_s16  ;;  %p1207_p12 = scmp.lt.u32.totalorder %s1199_s16, %s1427_s11 }
 0x4e9   : > { %p1201_p7 = pnand %p1200_p4, %p1333_p5 }
 0x4ea   : > { %p1206_p11 = por %p1205_p10, %p1204_p9 }
 0x4eb   : > { %p1202_p8 = pneg %p1201_p7 }
 0x4ec   : > { %p1208_p13 = por %p1207_p12, %p1206_p11 }
 0x4ee   : > { %p1209_p0 = pnand %p1208_p13, %p1202_p8 }
 0x4f0   : > { %1212 = shalt.err (!%p1209_p0)
}
 0x4f1   : > { %s1255_s22 = smov 128   ;;  %s1256_s27 = smov 8  }
 0x4f2   : > { %1122 = dma.vmem_to_hbm [thread:$0]  (%p1333_p5), %s1429_s29, 256, %s1427_s11, %s1435_s5, %s1255_s22, %s1255_s22, %s1256_s27  }
 0x4f3 PF: > { %p1128_p1 = scmp.ge.s32.totalorder %s1247_s26, 2  ;;  %s935_s30 = sand.u32 1, %s1235_s23  }
 0x4f4   : > { %s936_s10 = scalar_lea.sflag [#allocation4], %s935_s30 }
 0x4f5   : > { %p1125_p2 = pnand %p1128_p1, %p1337_p6 }
 0x4f7   : > { %1230 = dma.done.wait (!%p1125_p2), %s936_s10, 256  }
 0x4f8   : > { %1232 = vsyncadd (!%p1125_p2), %s936_s10, 4294967040  ;;  %p18_p3 = scmp.ge.s32.totalorder %s1320_s28, 4   ;;  %s1485_s23 = smov %s1239_s24 }
 0x4f9   : > { %s1486_s24 = smov %s1243_s25  ;;  %s1487_s25 = smov %s1331_s7 }
 0x4fa   : > { %s1488_s26 = smov %s1320_s28  ;;  %20 = sbr.rel (!%p18_p3) target bundleno = 6 (0x6), region = 85 }
 0x501   :  { %941 = vsyncpa [#allocation4], 1 }
 0x502   :  { %943 = vsyncpa [#allocation4 + $0x1], 1 }

</bundles_post_ra>
